<compile_context>
chip_gen: v6e
topology: v6e:2x2x1
jax: 0.10.0
libtpu: 0.0.40
codegen_flags: <defaults>
</compile_context>

<pallas_src>
import functools

import jax
import jax.numpy as jnp
from jax import lax
from jax.experimental import pallas as pl
from jax.experimental.pallas import tpu as pltpu

EPS = 1e-5


def fc_bn_relu_kernel(x_ref, w_ref, gb_ref, o_ref, *, matmul_dtype):
    # In-kernel cast right before the MXU dot: HBM streams stay f32 and are read
    # exactly once; the bf16 copies live only in VMEM/vregs.
    xb = x_ref[...].astype(matmul_dtype)
    wb = w_ref[...].astype(matmul_dtype)
    y = jnp.dot(xb, wb, preferred_element_type=jnp.float32)      # [B, tn] f32

    # Two-pass batch statistics per feature (no E[y^2]-mean^2 cancellation).
    inv_n = 1.0 / y.shape[0]
    mean = jnp.sum(y, axis=0, keepdims=True) * inv_n              # [1, tn]
    d = y - mean                                                  # [B, tn]
    var = jnp.sum(d * d, axis=0, keepdims=True) * inv_n           # [1, tn]

    gamma = gb_ref[0:1, :]
    beta = gb_ref[1:2, :]

    # Fold BN + affine into one per-feature scale (rsqrt -> EUP slot), then
    # normalize + affine + ReLU in a single elementwise pass.
    s = gamma * lax.rsqrt(var + EPS)                              # [1, tn]
    o_ref[...] = jnp.maximum(d * s + beta, 0.0).astype(o_ref.dtype)


def _select_tn(n_out, requested):
    """Largest lane-aligned feature tile that still yields >=2 grid steps."""
    if requested is not None:
        tn = min(requested, n_out)
        assert n_out % tn == 0, "n_out must be a multiple of the feature tile"
        assert tn % 128 == 0 or tn == n_out, "feature tile must be lane-aligned"
        return tn
    if n_out % 128 != 0 or n_out < 256:
        return n_out                      # full-extent tile, single grid step
    for cand in (512, 256, 128):          # biggest tile that keeps >=2 steps
        if n_out % cand == 0 and n_out // cand >= 2:
            return cand
    return n_out


def fully_connected_block(x, w, b, gamma, beta, *, tn=None,
                          matmul_dtype=jnp.bfloat16, out_dtype=None):
    """x: [B, n_in] f32, w: [n_in, n_out], b/gamma/beta: [1, n_out] -> [B, n_out].

    `b` is accepted for API fidelity with nn.Linear but is not fed to the kernel:
    train-mode BatchNorm subtracts the per-feature batch mean, which cancels a
    per-feature bias exactly (only valid for batch statistics, not running stats).
    """
    del b  # mathematically cancelled by train-mode BN

    B, K = x.shape
    Kw, N = w.shape
    assert K == Kw, "weight must be [n_in, n_out]"
    out_dtype = x.dtype if out_dtype is None else out_dtype

    tn = _select_tn(N, tn)
    n_steps = N // tn

    # Stack gamma/beta into one [2, N] parameter tile (one DMA per grid step).
    gb = jnp.concatenate(
        [gamma.reshape(1, N).astype(jnp.float32),
         beta.reshape(1, N).astype(jnp.float32)], axis=0)

    # ---- VMEM budget ---------------------------------------------------------
    bpe_x = jnp.dtype(x.dtype).itemsize
    bpe_w = jnp.dtype(w.dtype).itemsize
    bpe_mm = jnp.dtype(matmul_dtype).itemsize
    bpe_out = jnp.dtype(out_dtype).itemsize
    w_buffers = 3 if n_steps >= 3 else 2     # deeper W pipeline when grid is long

    x_bytes = B * K * bpe_x                         # single-buffered (constant block)
    w_bytes = K * tn * bpe_w * w_buffers
    gb_bytes = 2 * tn * 4 * 2
    out_bytes = B * tn * bpe_out * 2
    tmp_bytes = (B * K + K * tn) * bpe_mm + 2 * B * tn * 4   # bf16 casts + y + d
    working_set = x_bytes + w_bytes + gb_bytes + out_bytes + tmp_bytes

    try:
        vmem_cap = int(pltpu.get_tpu_info().vmem_capacity_bytes * 0.8)
    except Exception:
        vmem_cap = 48 << 20                  # v7x-safe conservative fallback

    if working_set + (2 << 20) > vmem_cap:
        # TODO(synk): add an accumulated-stats path (batch grid axis marked
        # 'arbitrary', per-feature sum/sumsq in VMEM scratch with pl.when
        # init/finalize, normalize in a second pass) for batches exceeding VMEM.
        raise ValueError(
            f"batch does not fit the single-pass VMEM budget "
            f"({working_set} B > {vmem_cap} B); accumulated-stats path not implemented")

    vmem_limit = int(min(max(working_set * 5 // 4 + (4 << 20), 16 << 20), vmem_cap))
    # --------------------------------------------------------------------------

    kernel = functools.partial(fc_bn_relu_kernel, matmul_dtype=matmul_dtype)

    return pl.pallas_call(
        kernel,
        out_shape=jax.ShapeDtypeStruct((B, N), out_dtype),
        grid_spec=pltpu.PrefetchScalarGridSpec(
            num_scalar_prefetch=0,
            grid=(n_steps,),
            in_specs=[
                # x: full batch, full n_in; block index never changes -> 1 buffer.
                pl.BlockSpec((B, K), lambda j: (0, 0),
                             pipeline_mode=pl.Buffered(1)),
                # W: column tile, streamed; deeper pipeline on long grids.
                pl.BlockSpec((K, tn), lambda j: (0, j),
                             pipeline_mode=pl.Buffered(w_buffers)),
                # stacked [gamma; beta] tile.
                pl.BlockSpec((2, tn), lambda j: (0, j)),
            ],
            out_specs=pl.BlockSpec((B, tn), lambda j: (0, j)),
        ),
        compiler_params=pltpu.CompilerParams(
            dimension_semantics=("parallel",),
            vmem_limit_bytes=vmem_limit,
        ),
    )(x, w, gb)


if __name__ == "__main__":
    # Small, deterministic setup: batch=8, n_in=32, n_out=256.
    B, N_IN, N_OUT = 8, 32, 256
    key = jax.random.PRNGKey(0)
    kx, kw, kb = jax.random.split(key, 3)

    x = jax.random.normal(kx, (B, N_IN), dtype=jnp.float32)

    # Deterministic synthetic parameters (no checkpoint load).
    bound = 1.0 / jnp.sqrt(N_IN)
    w = jax.random.uniform(kw, (N_IN, N_OUT), jnp.float32, -bound, bound)
    b = jax.random.uniform(kb, (1, N_OUT), jnp.float32, -bound, bound)
    gamma = jnp.ones((1, N_OUT), jnp.float32)   # BatchNorm1d default weight
    beta = jnp.zeros((1, N_OUT), jnp.float32)   # BatchNorm1d default bias

    out = fully_connected_block(x, w, b, gamma, beta)
    out = jax.block_until_ready(out)

    # Pure-JAX reference (Linear WITH bias -> train-mode BN -> ReLU), using
    # bf16-rounded matmul operands so the only deltas vs. the kernel are fp
    # accumulation order and the (exactly cancelling) bias.
    xb = x.astype(jnp.bfloat16).astype(jnp.float32)
    wb = w.astype(jnp.bfloat16).astype(jnp.float32)
    y_ref = xb @ wb + b
    mu = jnp.mean(y_ref, axis=0, keepdims=True)
    var = jnp.mean((y_ref - mu) ** 2, axis=0, keepdims=True)
    ref = jnp.maximum((y_ref - mu) / jnp.sqrt(var + EPS) * gamma + beta, 0.0)

    assert out.shape == (B, N_OUT)
    assert jnp.allclose(out, ref, atol=1e-3, rtol=1e-3), (
        float(jnp.max(jnp.abs(out - ref))))

    print("KERNEL_OK")
</pallas_src>

<mosaic_0001>
module attributes {stable_mosaic.version = 11 : i64} {
  func.func @fc_bn_relu_kernel(%arg0: i32, %arg1: memref<8x32xf32, #tpu.memory_space<vmem>>, %arg2: memref<32x128xf32, #tpu.memory_space<vmem>>, %arg3: memref<2x128xf32, #tpu.memory_space<vmem>>, %arg4: memref<8x128xf32, #tpu.memory_space<vmem>>) attributes {dimension_semantics = [#tpu.dimension_semantics<parallel>], iteration_bounds = array<i64: 2>, scalar_prefetch = 0 : i64, scratch_operands = 0 : i64, tpu.core_type = #tpu.core_type<tc>, window_params = [{pipeline_mode = #tpu.pipeline_mode<synchronous>, transform_indices = @transform_0, window_bounds = array<i64: 8, 32>}, {pipeline_mode = #tpu.pipeline_mode<double_buffered>, transform_indices = @transform_1, window_bounds = array<i64: 32, 128>}, {transform_indices = @transform_2, window_bounds = array<i64: 2, 128>}, {transform_indices = @transform_3, window_bounds = array<i64: 8, 128>}]} {
    %c0 = arith.constant 0 : index
    %c0_0 = arith.constant 0 : index
    %0 = vector.load %arg1[%c0, %c0_0] : memref<8x32xf32, #tpu.memory_space<vmem>>, vector<8x32xf32>
    %1 = arith.truncf %0 : vector<8x32xf32> to vector<8x32xbf16>
    %c0_1 = arith.constant 0 : index
    %c0_2 = arith.constant 0 : index
    %2 = vector.load %arg2[%c0_1, %c0_2] : memref<32x128xf32, #tpu.memory_space<vmem>>, vector<32x128xf32>
    %3 = arith.truncf %2 : vector<32x128xf32> to vector<32x128xbf16>
    %cst = arith.constant dense<0.000000e+00> : vector<8x128xf32>
    %4 = tpu.matmul %1, %3, %cst {dimension_numbers = #tpu.dot_dimension_numbers<[1], [0], [0], [1], [0, 0, 1, 1], [], []>} : vector<8x32xbf16>, vector<32x128xbf16>, vector<8x128xf32> -> vector<8x128xf32>
    %cst_3 = arith.constant dense<0.000000e+00> : vector<128xf32>
    %5 = vector.multi_reduction <add>, %4, %cst_3 [0] : vector<8x128xf32> to vector<128xf32>
    %6 = vector.shape_cast %5 : vector<128xf32> to vector<1x128xf32>
    %cst_4 = arith.constant 1.250000e-01 : f32
    %7 = vector.broadcast %cst_4 : f32 to vector<1x128xf32>
    %8 = arith.mulf %6, %7 : vector<1x128xf32>
    %9 = vector.broadcast %8 : vector<1x128xf32> to vector<8x128xf32>
    %10 = arith.subf %4, %9 : vector<8x128xf32>
    %11 = arith.mulf %10, %10 : vector<8x128xf32>
    %cst_5 = arith.constant dense<0.000000e+00> : vector<128xf32>
    %12 = vector.multi_reduction <add>, %11, %cst_5 [0] : vector<8x128xf32> to vector<128xf32>
    %13 = vector.shape_cast %12 : vector<128xf32> to vector<1x128xf32>
    %cst_6 = arith.constant 1.250000e-01 : f32
    %14 = vector.broadcast %cst_6 : f32 to vector<1x128xf32>
    %15 = arith.mulf %13, %14 : vector<1x128xf32>
    %c0_7 = arith.constant 0 : index
    %c0_8 = arith.constant 0 : index
    %16 = vector.load %arg3[%c0_7, %c0_8] : memref<2x128xf32, #tpu.memory_space<vmem>>, vector<1x128xf32>
    %c1 = arith.constant 1 : index
    %c0_9 = arith.constant 0 : index
    %17 = vector.load %arg3[%c1, %c0_9] : memref<2x128xf32, #tpu.memory_space<vmem>>, vector<1x128xf32>
    %cst_10 = arith.constant 9.99999974E-6 : f32
    %18 = vector.broadcast %cst_10 : f32 to vector<1x128xf32>
    %19 = arith.addf %15, %18 : vector<1x128xf32>
    %20 = math.rsqrt %19 : vector<1x128xf32>
    %21 = arith.mulf %16, %20 : vector<1x128xf32>
    %22 = vector.broadcast %21 : vector<1x128xf32> to vector<8x128xf32>
    %23 = arith.mulf %10, %22 : vector<8x128xf32>
    %24 = vector.broadcast %17 : vector<1x128xf32> to vector<8x128xf32>
    %25 = arith.addf %23, %24 : vector<8x128xf32>
    %cst_11 = arith.constant 0.000000e+00 : f32
    %26 = vector.broadcast %cst_11 : f32 to vector<8x128xf32>
    %27 = arith.maximumf %25, %26 : vector<8x128xf32>
    %c0_12 = arith.constant 0 : index
    %c0_13 = arith.constant 0 : index
    %28 = vector.load %arg4[%c0_12, %c0_13] : memref<8x128xf32, #tpu.memory_space<vmem>>, vector<8x128xf32>
    tpu.vector_store %arg4[%c0_12, %c0_13], %27 {strides = array<i32>} : memref<8x128xf32, #tpu.memory_space<vmem>>, vector<8x128xf32>,
    return
  }
  func.func @transform_0(%arg0: i32) -> (i32, i32) {
    %c0_i32 = arith.constant 0 : i32
    %c0_i32_0 = arith.constant 0 : i32
    %c0_i32_1 = arith.constant 0 : i32
    return %c0_i32, %c0_i32_0 : i32, i32
  }
  func.func @transform_1(%arg0: i32) -> (i32, i32) {
    %c0_i32 = arith.constant 0 : i32
    %c0_i32_0 = arith.constant 0 : i32
    return %c0_i32, %arg0 : i32, i32
  }
  func.func @transform_2(%arg0: i32) -> (i32, i32) {
    %c0_i32 = arith.constant 0 : i32
    %c0_i32_0 = arith.constant 0 : i32
    return %c0_i32, %arg0 : i32, i32
  }
  func.func @transform_3(%arg0: i32) -> (i32, i32) {
    %c0_i32 = arith.constant 0 : i32
    %c0_i32_0 = arith.constant 0 : i32
    return %c0_i32, %arg0 : i32, i32
  }
}

</mosaic_0001>

<bundles_post_ra>
// kernel: tpu_custom_call.1
= control target key start
LH: loop header
LB: loop body
LE: loop exit
PB: predicated region body
PF: predicated region fallthrough
CT: control target
= control target key end

     0   :  { %8 = vsyncpa [#allocation3], 0  ;;  %s920_s0 = inlined_call_operand.hbm [shape: f32[8,32], index: 0, kind: input, shape index: {}]   ;;  %s921_s1 = inlined_call_operand.hbm [shape: f32[32,256], index: 1, kind: input, shape index: {}]   ;;  %s922_s2 = inlined_call_operand.hbm [shape: f32[2,256], index: 2, kind: input, shape index: {}]   ;;  %s923_s3 = inlined_call_operand.hbm [shape: f32[8,256], index: 3, kind: output, shape index: {}]  }
   0x1   :  { %9 = vsyncpa [#allocation6], 0 }
   0x2   :  { %11 = vsyncpa [#allocation6 + $0x1], 0 }
   0x3   :  { %12 = vsyncpa [#allocation4], 0 }
   0x4   :  { %14 = vsyncpa [#allocation4 + $0x1], 0  ;;  %s717_s12 = smov 0   ;;  %s719_s13 = smov 0  }
   0x5   :  { %s721_s14 = smov 0   ;;  %s723_s15 = smov 0  }
   0x6 LB: > { %s738_s16 = sadd.s32 1, %s686_s15   ;;  %s48_s17 = sadd.s32 1, %s682_s14  ;;  %s686_s15 = sphi %s723_s15, %s943_s15   ;;  %s682_s14 = sphi %s721_s14, %s942_s14   ;;  %s678_s13 = sphi %s719_s13, %s941_s13   ;;  %s674_s12 = sphi %s717_s12, %s940_s12  }
   0x7   : > { %s45_s18 = ssub.s32 %s686_s15, %s738_s16  ;;  %p55_p0 = scmp.ne.s32.totalorder %s682_s14, %s678_s13 }
   0x8   : > { %p46_p1 = scmp.eq.s32.totalorder %s45_s18, 0  ;;  %p56_p2 = scmp.eq.s32.totalorder %s686_s15, 0 }
   0x9   : > { %p493_p4 = scmp.lt.s32.totalorder %s686_s15, 2  ;;  %s148_s20 = sand.u32 1, %s686_s15  }
   0xa   : > { %s749_s19 = scalar_select %p46_p1, %s682_s14, %s48_s17  }
   0xb   : > { %p57_p5 = por %p56_p2, %p55_p0  ;;  %s150_s21 = sand.u32 1, %s682_s14  }
   0xc   : > { %s441_s22 = sshll.u32 %s150_s21, 5  ;;  %s442_s23 = sshll.u32 %s686_s15, 7 }
   0xd   : > { %s762_s26 = scalar_lea.hbm %s921_s1, %s442_s23  ;;  %s152_s27 = scalar_lea.vmem [#allocation5], %s441_s22 }
   0xe   : > { %s158_s28 = sshll.u32 %s152_s27, 4  ;;  %p764_p6 = pnand %p493_p4, %p57_p5  ;;  %s768_s28 = int_to_ptr.vmem [resolvable:$true] %s158_s28 }
   0xf   : > { %s770_s30 = scalar_lea.sflag [#allocation6], %s148_s20  ;;  %s536_s4 = scalar_lea.hbm %s762_s26, 512 }
  0x10   : > { %p537_p7 = scmp.ne.s32.totalorder %s762_s26, %s536_s4  ;;  %p924_p8 = pneg %p764_p6 }
  0x11   : > { %s541_s7 = scalar_lea.hbm %s921_s1, 1024  ;;  %p542_p11 = scmp.lt.s32.totalorder %s762_s26, %s921_s1 }
  0x12   : > { %p539_p9 = pnand %p924_p8, %p537_p7  ;;  %p543_p12 = scmp.lt.s32.totalorder %s541_s7, %s536_s4 }
  0x14   : > { %p540_p10 = pneg %p539_p9  ;;  %p544_p13 = por %p543_p12, %p542_p11 }
  0x16   : > { %p545_p1 = pnand %p544_p13, %p540_p10 }
  0x18   : > { %548 = shalt.err (!%p545_p1)
}
  0x19   : > { %s549_s10 = scalar_lea.vmem %s768_s28, 512  ;;  %s688_s11 = smov [#allocation5]  }
  0x1a   : > { %p550_p2 = scmp.ne.s32.totalorder %s768_s28, %s549_s10  ;;  %s554_s17 = sshll.u32 %s688_s11, 4  ;;  %s555_s17 = int_to_ptr.vmem [resolvable:$false] %s554_s17 }
  0x1b   : > { %s556_s18 = scalar_lea.vmem %s555_s17, 1024  ;;  %p557_p7 = scmp.lt.s32.totalorder %s768_s28, %s555_s17 }
  0x1c   : > { %p552_p4 = pnand %p550_p2, %p924_p8  ;;  %p558_p9 = scmp.lt.s32.totalorder %s556_s18, %s549_s10 }
  0x1e   : > { %p553_p5 = pneg %p552_p4  ;;  %p559_p3 = por %p558_p9, %p557_p7 }
  0x20   : > { %p560_p11 = pnand %p559_p3, %p553_p5 }
  0x22   : > { %563 = shalt.err (!%p560_p11)
}
  0x23   : > { %s689_s20 = smov 256   ;;  %s690_s22 = smov 128  }
  0x24   : > { %s691_s23 = smov 8   ;;  %s798_s24 = sadd.s32 4294967295, %s686_s15  }
  0x25   : > { %484 = dma.hbm_to_vmem [thread:$0]  (!%p764_p6), %s762_s26, 512, %s768_s28, %s770_s30, %s689_s20, %s690_s22, %s691_s23  }
  0x26   : > { %s437_s25 = sadd.s32 4294967294, %s686_s15   ;;  %p61_p3 = scmp.ne.s32.totalorder %s678_s13, %s674_s12 }
  0x27   : > { %p926_p10 = scmp.eq.s32.totalorder %s798_s24, 0  ;;  %p111_p12 = scmp.eq.s32.totalorder %s798_s24, 1 }
  0x28   : > { %p117_p13 = scmp.eq.s32.totalorder %s437_s25, 1  ;;  %p438_p1 = scmp.ge.s32.totalorder %s686_s15, 1 }
  0x29   : > { %p808_p2 = por %p926_p10, %p61_p3  ;;  %p815_p4 = por %p111_p12, %p55_p0 }
  0x2a   : > { %p819_p5 = por %p117_p13, %p61_p3  ;;  %p124_p7 = scmp.lt.s32.totalorder %s686_s15, 3 }
  0x2b   : > { %s929_s27 = scalar_select %p808_p2, 1, 0 }
  0x2c   : > { %s930_s26 = scalar_select %p815_p4, 1, 0 }
  0x2d   : > { %s931_s28 = scalar_select %p819_p5, 1, 0 }
  0x2e   : > { %p824_p9 = pnand %p438_p1, %p124_p7  ;;  %s692_s5 = smov [#allocation2]  }
  0x2f   : > { %s137_s6 = sshll.u32 %s692_s5, 4  ;;  %s443_s7 = sshll.u32 %s150_s21, 1  ;;  %s138_s6 = int_to_ptr.vmem [resolvable:$true] %s137_s6 }
  0x30   : > { %p477_p11 = pneg %p824_p9  ;;  %s444_s8 = sshll.u32 %s686_s15, 5 }
  0x31   : > { %s172_s9 = scalar_lea.vmem [#allocation7], %s443_s7  ;;  %s838_s18 = scalar_lea.hbm %s922_s2, %s444_s8 }
  0x32   : > { %s179_s10 = sshll.u32 %s172_s9, 4  ;;  %p478_p0 = pnand %p477_p11, %p926_p10  ;;  %s840_s10 = int_to_ptr.vmem [resolvable:$true] %s179_s10 }
  0x33   : > { %s575_s20 = scalar_lea.vmem %s138_s6, 128  ;;  %p583_p7 = scmp.lt.s32.totalorder %s138_s6, %s138_s6 }
  0x34   : > { %p566_p3 = pneg %p478_p0  ;;  %p576_p12 = scmp.ne.s32.totalorder %s138_s6, %s575_s20 }
  0x35   : > { %p584_p8 = scmp.lt.s32.totalorder %s575_s20, %s575_s20 }
  0x36   : > { %p578_p13 = pnand %p576_p12, %p566_p3 }
  0x37   : > { %p585_p5 = por %p584_p8, %p583_p7 }
  0x38   : > { %p579_p1 = pneg %p578_p13 }
  0x3a   : > { %p586_p4 = pnand %p585_p5, %p579_p1 }
  0x3c   : > { %589 = shalt.err (!%p586_p4)
}
  0x3d   : > { %480 = dma.hbm_to_vmem [thread:$0]  (!%p478_p0), %s920_s0, 128, %s138_s6, [#allocation3]  }
  0x3e   : > { %s590_s23 = scalar_lea.hbm %s838_s18, 32  ;;  %p933_p10 = pneg %p764_p6 }
  0x3f   : > { %p591_p11 = scmp.ne.s32.totalorder %s838_s18, %s590_s23  ;;  %s595_s7 = scalar_lea.hbm %s922_s2, 64 }
  0x40   : > { %p596_p8 = scmp.lt.s32.totalorder %s838_s18, %s922_s2  ;;  %p597_p4 = scmp.lt.s32.totalorder %s595_s7, %s590_s23 }
  0x41   : > { %p593_p2 = pnand %p591_p11, %p933_p10 }
  0x42   : > { %p598_p5 = por %p597_p4, %p596_p8 }
  0x43   : > { %p594_p3 = pneg %p593_p2 }
  0x45   : > { %p599_p12 = pnand %p598_p5, %p594_p3 }
  0x47   : > { %602 = shalt.err (!%p599_p12)
}
  0x48   : > { %s603_s6 = scalar_lea.vmem %s840_s10, 32  ;;  %s693_s11 = smov [#allocation7]  }
  0x49   : > { %p604_p0 = scmp.ne.s32.totalorder %s840_s10, %s603_s6  ;;  %s608_s17 = sshll.u32 %s693_s11, 4  ;;  %s609_s17 = int_to_ptr.vmem [resolvable:$false] %s608_s17 }
  0x4a   : > { %s610_s20 = scalar_lea.vmem %s609_s17, 64  ;;  %p611_p1 = scmp.lt.s32.totalorder %s840_s10, %s609_s17 }
  0x4b   : > { %p606_p2 = pnand %p604_p0, %p933_p10  ;;  %p612_p7 = scmp.lt.s32.totalorder %s610_s20, %s603_s6 }
  0x4d   : > { %p607_p13 = pneg %p606_p2  ;;  %p613_p11 = por %p612_p7, %p611_p1 }
  0x4f   : > { %p614_p8 = pnand %p613_p11, %p607_p13 }
  0x51   : > { %617 = shalt.err (!%p614_p8)
}
  0x52   : > { %487 = dma.hbm_to_vmem [thread:$0]  (!%p764_p6), %s838_s18, 32, %s840_s10, %s770_s30  }
  0x53   : > { %188 = sbr.rel (%p824_p9) target bundleno = 368 (0x170), region = 32  ;;  %p934_p3 = scmp.eq.s32.totalorder (!%p824_p9), %s798_s24, 0 }
  0x58   : > { %661 = dma.done.wait (%p934_p3), [#allocation3], 128   ;;  %p935_p4 = pmov %p934_p3 }
  0x59   : > { %s194_s21 = sand.u32 1, %s798_s24   ;;  %s876_s22 = sand.u32 1, %s678_s13  }
  0x5a   : > { %663 = vsyncadd (%p935_p4), [#allocation3], 4294967168  ;;  %s447_s29 = sshll.u32 %s876_s22, 5  ;;  %s195_s23 = scalar_lea.sflag [#allocation6], %s194_s21 }
  0x5b   : > { %s198_s25 = scalar_lea.vmem [#allocation5], %s447_s29  ;;  %p936_p6 = scmp.ne.s32.totalorder %s929_s27, 0 }
  0x5d   : > { %665 = dma.done.wait (%p936_p6), %s195_s23, 544  }
  0x5e   : > { %667 = vsyncadd (%p936_p6), %s195_s23, 4294966752  ;;  %v694_v0 = vmov 0.0   ;;  %vm695_vm0 = vmmov 0   ;;  %v240_v1 = vld [vmem:[%s198_s25 + $0x10] sm:$0xff]  ;;  %v241_v2 = vld [vmem:[%s198_s25 + $0x18] sm:$0xff]  ;;  %vm244_vm1 = vcmask 261120   ;;  %v309_v30 = vlaneseq }
  0x5f   : > { %459 = vmatprep.subr.bf16.mxu0 %v694_v0  ;;  %463 = vmatprep.mubr.msk.bf16.mxu0 %vm695_vm0, %v694_v0  ;;  %v238_v3 = vld [vmem:[%s198_s25] sm:$0xff]  ;;  %v243_v4 = vpack.c.bf16 %v241_v2, %v240_v1  ;;  %v239_v5 = vld [vmem:[%s198_s25 + $0x8] sm:$0xff]  ;;  %v236_v7 = vld [vmem:[#allocation2] sm:$0xff]  ;;  %s448_s30 = sshll.u32 %s876_s22, 1  ;;  %s449_s4 = sshll.u32 %s876_s22, 3 }
  0x60   : > { %v242_v6 = vpack.c.bf16 %v239_v5, %v238_v3  ;;  %v237_v8 = vpack.c.bf16 %v236_v7, %v236_v7  ;;  %v310_v31 = vshrl.u32 %v309_v30, 7  ;;  %s207_s27 = scalar_lea.vmem [#allocation7], %s448_s30  ;;  %s453_s10 = sshll.u32 %s798_s24, 7 }
  0x61   : > { %460 = vmatpush3.bf16.msra.mxu0 %v243_v4  ;;  %v304_v32 = vld [vmem:[%s207_s27] sm:$0x1]  ;;  %v451_v37 = vld [vmem:[%s207_s27 + $0x1] ss:$0 sm:$0xff]  ;;  %s234_s18 = scalar_lea.vmem [#allocation8], %s449_s4  ;;  %s333_s9 = scalar_lea.hbm %s923_s3, %s453_s10 }
  0x62   : > { %461 = vmatprep.subr.bf16.mxu0 %v694_v0  ;;  %v311_v33 = vsub.s32 0, %v310_v31  ;;  %s335_s5 = sshll.u32 %s234_s18, 4  ;;  %s322_s6 = scalar_lea.sflag [#allocation4], %s876_s22  ;;  %s336_s5 = int_to_ptr.vmem [resolvable:$true] %s335_s5 }
  0x63   : > { %s618_s11 = scalar_lea.vmem %s336_s5, 128  ;;  %p937_p5 = scmp.ne.s32.totalorder %s930_s26, 0 }
  0x64   : > { %p619_p9 = scmp.ne.s32.totalorder %s336_s5, %s618_s11  ;;  %s696_s17 = smov [#allocation8]  }
  0x65   : > { %462 = vmatpush3.bf16.msra.mxu0 %v242_v6  ;;  %s622_s20 = sshll.u32 %s696_s17, 4  ;;  %s623_s20 = int_to_ptr.vmem [resolvable:$false] %s622_s20 }
  0x66   : > { %p620_p12 = pnand %p619_p9, %p937_p5  ;;  %s624_s24 = scalar_lea.vmem %s623_s20, 256 }
  0x67   : > { %p625_p10 = scmp.lt.s32.totalorder %s336_s5, %s623_s20  ;;  %p626_p2 = scmp.lt.s32.totalorder %s624_s24, %s618_s11 }
  0x68   : > { %464 = vmatmul.mubr.msk.bf16.vlgmr.msra.gmra.mxu0 %vm244_vm1, %v237_v8  ;;  %p621_p0 = pneg %p620_p12 }
  0x69   : > { %p627_p13 = por %p626_p2, %p625_p10 }
  0x6b   : > { %p628_p1 = pnand %p627_p13, %p621_p0 }
 0x128   : > { %v282_v9 = vpop.f32.mrf.mxu0 }
 0x129   : > { %v288_v10 = vrot.slane %v282_v9, 4 }
 0x12a   : > { %v465_v11 = vpop.f32.mrf.mxu0 }
 0x12b   : > { %v289_v12 = vadd.f32 %v288_v10, %v282_v9 }
 0x12c   : > { %v285_v13 = vpop.f32.mrf.mxu0 }
 0x12d   : > { %v290_v14 = vrot.slane %v289_v12, 2 }
 0x12e   : > { %v466_v15 = vpop.f32.mrf.mxu0 }
 0x12f   : > { %v291_v16 = vadd.f32 %v290_v14, %v289_v12 }
 0x131   : > { %v292_v17 = vrot.slane %v291_v16, 1 }
 0x133   : > { %v293_v18 = vadd.f32 %v292_v17, %v291_v16 }
 0x135   : > { %v294_v19 = vmul.f32 0.125, %v293_v18 }
 0x137   : > { %v295_v20 = vsub.f32 %v282_v9, %v294_v19 }
 0x139   : > { %v296_v21 = vmul.f32 %v295_v20, %v295_v20 }
 0x13b   : > { %v297_v22 = vrot.slane %v296_v21, 4 }
 0x13d   : > { %v298_v23 = vadd.f32 %v297_v22, %v296_v21 }
 0x13f   : > { %v299_v24 = vrot.slane %v298_v23, 2 }
 0x141   : > { %v300_v25 = vadd.f32 %v299_v24, %v298_v23 }
 0x143   : > { %v301_v26 = vrot.slane %v300_v25, 1 }
 0x145   : > { %v302_v27 = vadd.f32 %v301_v26, %v300_v25 }
 0x147   : > { %v303_v28 = vmul.f32 0.125, %v302_v27 }
 0x149   : > { %v306_v29 = vadd.f32 1e-05, %v303_v28 }
 0x14b   : > { %534 = vrsqrt.f32 %v306_v29 }
 0x158   : > { %v535_v34 = vpop.eup %534 }
 0x159   : > { %v308_v35 = vmul.f32 %v535_v34, %v304_v32 }
 0x15b   : > { %v312_v36 = vrot.slane %v308_v35, %v311_v33 }
 0x15d   : > { %v313_v38 = vmul.f32 %v312_v36, %v295_v20 }
 0x15f   : > { %v318_v39 = vadd.f32 %v451_v37, %v313_v38 }
 0x161   : > { %v319_v40 = vmax.f32 %v318_v39, 0.0 }
 0x163   : > { %320 = vst [vmem:[%s234_s18] sm:$0xff] %v319_v40 }
 0x164   : > { %631 = shalt.err (!%p628_p1)
}
 0x165   : > { %s632_s21 = scalar_lea.hbm %s333_s9, 128  ;;  %s636_s23 = scalar_lea.hbm %s923_s3, 256 }
 0x166   : > { %p633_p7 = scmp.ne.s32.totalorder %s333_s9, %s632_s21  ;;  %p637_p3 = scmp.lt.s32.totalorder %s333_s9, %s923_s3 }
 0x167   : > { %p638_p4 = scmp.lt.s32.totalorder %s636_s23, %s632_s21 }
 0x168   : > { %p634_p11 = pnand %p633_p7, %p937_p5 }
 0x169   : > { %p639_p6 = por %p638_p4, %p637_p3 }
 0x16a   : > { %p635_p8 = pneg %p634_p11 }
 0x16c   : > { %p640_p9 = pnand %p639_p6, %p635_p8 }
 0x16e   : > { %643 = shalt.err (!%p640_p9)
}
 0x16f   : > { %475 = dma.vmem_to_hbm [thread:$0]  (%p937_p5), %s336_s5, 128, %s333_s9, %s322_s6  }
 0x170 PF: > { %s347_s27 = sand.u32 1, %s674_s12   ;;  %p938_p12 = scmp.ne.s32.totalorder %s931_s28, 0 }
 0x171   : > { %p939_p0 = scmp.ge.s32.totalorder %s686_s15, 2  ;;  %s348_s4 = scalar_lea.sflag [#allocation4], %s347_s27 }
 0x173   : > { %p489_p10 = pnand %p939_p0, %p938_p12 }
 0x175   : > { %p490_p2 = pneg %p489_p10 }
 0x177   : > { %669 = dma.done.wait (%p490_p2), %s348_s4, 128  }
 0x178   : > { %671 = vsyncadd (%p490_p2), %s348_s4, 4294967168  ;;  %p17_p13 = scmp.ge.s32.totalorder %s738_s16, 4   ;;  %s940_s12 = smov %s678_s13 }
 0x179   : > { %s941_s13 = smov %s682_s14  ;;  %s942_s14 = smov %s749_s19 }
 0x17a   : > { %s943_s15 = smov %s738_s16  ;;  %19 = sbr.rel (!%p17_p13) target bundleno = 6 (0x6), region = 93 }
 0x17f   :  { %353 = vsyncpa [#allocation3], 1 }
 0x180   :  { %355 = vsyncpa [#allocation3 + $0x1], 1 }
 0x181   :  { %356 = vsyncpa [#allocation6], 1 }
 0x182   :  { %358 = vsyncpa [#allocation6 + $0x1], 1 }
 0x183   :  { %359 = vsyncpa [#allocation4], 1 }
 0x184   :  { %361 = vsyncpa [#allocation4 + $0x1], 1 }

</bundles_post_ra>
